<compile_context>
chip_gen: v6e
topology: v6e:2x2x1
jax: 0.10.0
libtpu: 0.0.40
codegen_flags: <defaults>
</compile_context>

<pallas_src>
import functools
import math

import jax
import jax.numpy as jnp
import numpy as np
from jax import lax
from jax.experimental import pallas as pl
from jax.experimental.pallas import tpu as pltpu


def _attn_kernel(q_ref, k_ref, v_ref, sp_ref, inv_ref, o_ref, *, scale, heads, e_dim, d_dim):
    # q_ref: (TL, H*E), k_ref: (S, H*E), v_ref: (S, H*D)
    # sp_ref: (TL, S) f32 = softplus(W) rows for this tile
    # inv_ref: (TL, 1) f32 = 1 / (1 + rowsum(softplus(W)))
    # o_ref: (TL, H*D)
    sp = sp_ref[...]
    inv_denom = inv_ref[...]

    outs = []
    for h in range(heads):  # static unroll over heads; each head = two small MXU matmuls
        q_h = q_ref[:, h * e_dim:(h + 1) * e_dim]        # (TL, E), native dtype
        k_h = k_ref[:, h * e_dim:(h + 1) * e_dim]        # (S, E)
        v_h = v_ref[:, h * d_dim:(h + 1) * d_dim]        # (S, D)

        # scores = (Q K^T) * scale  — contract on E for both operands (no in-kernel .T)
        scores = lax.dot_general(
            q_h, k_h, (((1,), (1,)), ((), ())),
            preferred_element_type=jnp.float32) * scale   # (TL, S) f32

        # row-wise softmax in f32
        m = jnp.max(scores, axis=-1, keepdims=True)
        e = jnp.exp(scores - m)
        p = e * pl.reciprocal(jnp.sum(e, axis=-1, keepdims=True), approx=False)

        # A = softmax + softplus(W); the L1 normalization is deferred past the matmul:
        #   (A / denom) @ V == (A @ V) * (1 / denom),   denom = 1 + rowsum(softplus(W))
        # (exact because softmax rows sum to 1 and every entry of A is non-negative)
        a = (p + sp).astype(v_h.dtype)
        o_h = jnp.dot(a, v_h, preferred_element_type=jnp.float32) * inv_denom  # (TL, D)
        outs.append(o_h)

    # single lane-dense (TL, H*D) store
    o_ref[...] = jnp.concatenate(outs, axis=-1).astype(o_ref.dtype)


def _pick_row_tile(L):
    for t in (512, 256, 128):
        if L % t == 0:
            return t
    return L


def rowwise_enhanced_attention(queries, keys, values, weight_mat, scale=None):
    """queries: (B, L, H, E), keys: (B, S, H, E), values: (B, S, H, D),
    weight_mat: (1, 1, L, S).  Returns (B, L, H, D).  Eval-mode, unmasked path."""
    B, L, H, E = queries.shape
    _, S, _, D = values.shape
    scale = scale if scale is not None else 1.0 / math.sqrt(E)

    # Grid-invariant pieces, hoisted out of the kernel (computed once per call).
    sp = jax.nn.softplus(weight_mat.reshape(L, S).astype(jnp.float32))      # (L, S)
    inv_denom = 1.0 / (1.0 + jnp.sum(sp, axis=-1, keepdims=True))           # (L, 1)

    # Lane-dense views of the original PyTorch layout — free reshapes, no HBM transposes.
    q2 = queries.reshape(B, L, H * E)
    k2 = keys.reshape(B, S, H * E)
    v2 = values.reshape(B, S, H * D)

    TL = _pick_row_tile(L)
    grid = (B, L // TL)

    kernel = functools.partial(_attn_kernel, scale=scale, heads=H, e_dim=E, d_dim=D)

    out = pl.pallas_call(
        kernel,
        out_shape=jax.ShapeDtypeStruct((B, L, H * D), queries.dtype),
        grid_spec=pltpu.PrefetchScalarGridSpec(
            num_scalar_prefetch=0,
            grid=grid,
            in_specs=[
                pl.BlockSpec((None, TL, H * E), lambda b, l: (b, l, 0)),  # Q rows tile
                pl.BlockSpec((None, S, H * E), lambda b, l: (b, 0, 0)),   # full K
                pl.BlockSpec((None, S, H * D), lambda b, l: (b, 0, 0)),   # full V
                pl.BlockSpec((TL, S), lambda b, l: (l, 0)),               # softplus(W) rows
                pl.BlockSpec((TL, 1), lambda b, l: (l, 0)),               # 1/denom rows
            ],
            out_specs=pl.BlockSpec((None, TL, H * D), lambda b, l: (b, l, 0)),
        ),
        compiler_params=pltpu.CompilerParams(
            dimension_semantics=("parallel", "parallel"),
            vmem_limit_bytes=32 * 1024 * 1024,
        ),
    )(q2, k2, v2, sp, inv_denom)

    return out.reshape(B, L, H, D)


def _reference(queries, keys, values, weight_mat, scale=None):
    # Faithful (un-simplified) math for validation.
    B, L, H, E = queries.shape
    scale = scale if scale is not None else 1.0 / math.sqrt(E)
    A = jnp.einsum("blhe,bshe->bhls", queries, keys) * scale
    A = jax.nn.softmax(A, axis=-1) + jax.nn.softplus(weight_mat)
    A = A / jnp.maximum(jnp.sum(jnp.abs(A), axis=-1, keepdims=True), 1e-12)
    return jnp.einsum("bhls,bshd->blhd", A, values)


if __name__ == "__main__":
    key = jax.random.PRNGKey(0)
    kq, kk, kv, kw = jax.random.split(key, 4)

    B, L, S, H, E, D = 2, 8, 8, 4, 32, 32
    token_num = L  # module requires token_num == query length for weight_mat slicing

    queries = jax.random.normal(kq, (B, L, H, E), dtype=jnp.float32)
    keys = jax.random.normal(kk, (B, S, H, E), dtype=jnp.float32)
    values = jax.random.normal(kv, (B, S, H, D), dtype=jnp.float32)
    weight_mat = jax.random.normal(kw, (1, 1, token_num, token_num), dtype=jnp.float32)

    out = rowwise_enhanced_attention(queries, keys, values, weight_mat)
    out = jax.block_until_ready(out)

    ref = _reference(queries, keys, values, weight_mat)
    np.testing.assert_allclose(np.asarray(out), np.asarray(ref), rtol=1e-5, atol=1e-5)

    print("KERNEL_OK")
</pallas_src>

<mosaic_0001>
module attributes {stable_mosaic.version = 11 : i64} {
  func.func @_attn_kernel(%arg0: i32, %arg1: i32, %arg2: memref<1x8x128xf32, #tpu.memory_space<vmem>>, %arg3: memref<1x8x128xf32, #tpu.memory_space<vmem>>, %arg4: memref<1x8x128xf32, #tpu.memory_space<vmem>>, %arg5: memref<8x8xf32, #tpu.memory_space<vmem>>, %arg6: memref<8x1xf32, #tpu.memory_space<vmem>>, %arg7: memref<1x8x128xf32, #tpu.memory_space<vmem>>) attributes {dimension_semantics = [#tpu.dimension_semantics<parallel>, #tpu.dimension_semantics<parallel>], iteration_bounds = array<i64: 2, 1>, scalar_prefetch = 0 : i64, scratch_operands = 0 : i64, tpu.core_type = #tpu.core_type<tc>, window_params = [{transform_indices = @transform_0, window_bounds = array<i64: 1, 8, 128>}, {transform_indices = @transform_1, window_bounds = array<i64: 1, 8, 128>}, {transform_indices = @transform_2, window_bounds = array<i64: 1, 8, 128>}, {transform_indices = @transform_3, window_bounds = array<i64: 8, 8>}, {transform_indices = @transform_4, window_bounds = array<i64: 8, 1>}, {transform_indices = @transform_5, window_bounds = array<i64: 1, 8, 128>}]} {
    %c0 = arith.constant 0 : index
    %c0_0 = arith.constant 0 : index
    %0 = vector.load %arg5[%c0, %c0_0] : memref<8x8xf32, #tpu.memory_space<vmem>>, vector<8x8xf32>
    %c0_1 = arith.constant 0 : index
    %c0_2 = arith.constant 0 : index
    %1 = vector.load %arg6[%c0_1, %c0_2] : memref<8x1xf32, #tpu.memory_space<vmem>>, vector<8x1xf32>
    %c0_3 = arith.constant 0 : index
    %c0_4 = arith.constant 0 : index
    %c0_5 = arith.constant 0 : index
    %2 = vector.load %arg2[%c0_3, %c0_4, %c0_5] : memref<1x8x128xf32, #tpu.memory_space<vmem>>, vector<1x8x32xf32>
    %3 = vector.shape_cast %2 : vector<1x8x32xf32> to vector<8x32xf32>
    %c0_6 = arith.constant 0 : index
    %c0_7 = arith.constant 0 : index
    %c0_8 = arith.constant 0 : index
    %4 = vector.load %arg3[%c0_6, %c0_7, %c0_8] : memref<1x8x128xf32, #tpu.memory_space<vmem>>, vector<1x8x32xf32>
    %5 = vector.shape_cast %4 : vector<1x8x32xf32> to vector<8x32xf32>
    %c0_9 = arith.constant 0 : index
    %c0_10 = arith.constant 0 : index
    %c0_11 = arith.constant 0 : index
    %6 = vector.load %arg4[%c0_9, %c0_10, %c0_11] : memref<1x8x128xf32, #tpu.memory_space<vmem>>, vector<1x8x32xf32>
    %7 = vector.shape_cast %6 : vector<1x8x32xf32> to vector<8x32xf32>
    %cst = arith.constant dense<0.000000e+00> : vector<8x8xf32>
    %8 = tpu.matmul %3, %5, %cst {dimension_numbers = #tpu.dot_dimension_numbers<[1], [1], [0], [0], [0, 0, 1, 0], [], []>} : vector<8x32xf32>, vector<8x32xf32>, vector<8x8xf32> -> vector<8x8xf32>
    %cst_12 = arith.constant 0.176776692 : f32
    %9 = vector.broadcast %cst_12 : f32 to vector<8x8xf32>
    %10 = arith.mulf %8, %9 : vector<8x8xf32>
    %cst_13 = arith.constant dense<0xFF800000> : vector<8xf32>
    %11 = vector.multi_reduction <maximumf>, %10, %cst_13 [1] : vector<8x8xf32> to vector<8xf32>
    %12 = vector.shape_cast %11 : vector<8xf32> to vector<8x1xf32>
    %13 = vector.broadcast %12 : vector<8x1xf32> to vector<8x8xf32>
    %14 = arith.subf %10, %13 : vector<8x8xf32>
    %15 = math.exp %14 : vector<8x8xf32>
    %cst_14 = arith.constant dense<0.000000e+00> : vector<8xf32>
    %16 = vector.multi_reduction <add>, %15, %cst_14 [1] : vector<8x8xf32> to vector<8xf32>
    %17 = vector.shape_cast %16 : vector<8xf32> to vector<8x1xf32>
    %18 = tpu.reciprocal %17 : vector<8x1xf32> -> vector<8x1xf32>
    %19 = vector.broadcast %18 : vector<8x1xf32> to vector<8x8xf32>
    %20 = arith.mulf %15, %19 : vector<8x8xf32>
    %21 = arith.addf %20, %0 : vector<8x8xf32>
    %cst_15 = arith.constant dense<0.000000e+00> : vector<8x32xf32>
    %22 = tpu.matmul %21, %7, %cst_15 {dimension_numbers = #tpu.dot_dimension_numbers<[1], [0], [0], [1], [0, 0, 1, 1], [], []>} : vector<8x8xf32>, vector<8x32xf32>, vector<8x32xf32> -> vector<8x32xf32>
    %23 = vector.broadcast %1 : vector<8x1xf32> to vector<8x32xf32>
    %24 = arith.mulf %22, %23 : vector<8x32xf32>
    %c0_16 = arith.constant 0 : index
    %c0_17 = arith.constant 0 : index
    %c32 = arith.constant 32 : index
    %25 = vector.load %arg2[%c0_16, %c0_17, %c32] : memref<1x8x128xf32, #tpu.memory_space<vmem>>, vector<1x8x32xf32>
    %26 = vector.shape_cast %25 : vector<1x8x32xf32> to vector<8x32xf32>
    %c0_18 = arith.constant 0 : index
    %c0_19 = arith.constant 0 : index
    %c32_20 = arith.constant 32 : index
    %27 = vector.load %arg3[%c0_18, %c0_19, %c32_20] : memref<1x8x128xf32, #tpu.memory_space<vmem>>, vector<1x8x32xf32>
    %28 = vector.shape_cast %27 : vector<1x8x32xf32> to vector<8x32xf32>
    %c0_21 = arith.constant 0 : index
    %c0_22 = arith.constant 0 : index
    %c32_23 = arith.constant 32 : index
    %29 = vector.load %arg4[%c0_21, %c0_22, %c32_23] : memref<1x8x128xf32, #tpu.memory_space<vmem>>, vector<1x8x32xf32>
    %30 = vector.shape_cast %29 : vector<1x8x32xf32> to vector<8x32xf32>
    %cst_24 = arith.constant dense<0.000000e+00> : vector<8x8xf32>
    %31 = tpu.matmul %26, %28, %cst_24 {dimension_numbers = #tpu.dot_dimension_numbers<[1], [1], [0], [0], [0, 0, 1, 0], [], []>} : vector<8x32xf32>, vector<8x32xf32>, vector<8x8xf32> -> vector<8x8xf32>
    %cst_25 = arith.constant 0.176776692 : f32
    %32 = vector.broadcast %cst_25 : f32 to vector<8x8xf32>
    %33 = arith.mulf %31, %32 : vector<8x8xf32>
    %cst_26 = arith.constant dense<0xFF800000> : vector<8xf32>
    %34 = vector.multi_reduction <maximumf>, %33, %cst_26 [1] : vector<8x8xf32> to vector<8xf32>
    %35 = vector.shape_cast %34 : vector<8xf32> to vector<8x1xf32>
    %36 = vector.broadcast %35 : vector<8x1xf32> to vector<8x8xf32>
    %37 = arith.subf %33, %36 : vector<8x8xf32>
    %38 = math.exp %37 : vector<8x8xf32>
    %cst_27 = arith.constant dense<0.000000e+00> : vector<8xf32>
    %39 = vector.multi_reduction <add>, %38, %cst_27 [1] : vector<8x8xf32> to vector<8xf32>
    %40 = vector.shape_cast %39 : vector<8xf32> to vector<8x1xf32>
    %41 = tpu.reciprocal %40 : vector<8x1xf32> -> vector<8x1xf32>
    %42 = vector.broadcast %41 : vector<8x1xf32> to vector<8x8xf32>
    %43 = arith.mulf %38, %42 : vector<8x8xf32>
    %44 = arith.addf %43, %0 : vector<8x8xf32>
    %cst_28 = arith.constant dense<0.000000e+00> : vector<8x32xf32>
    %45 = tpu.matmul %44, %30, %cst_28 {dimension_numbers = #tpu.dot_dimension_numbers<[1], [0], [0], [1], [0, 0, 1, 1], [], []>} : vector<8x8xf32>, vector<8x32xf32>, vector<8x32xf32> -> vector<8x32xf32>
    %46 = vector.broadcast %1 : vector<8x1xf32> to vector<8x32xf32>
    %47 = arith.mulf %45, %46 : vector<8x32xf32>
    %c0_29 = arith.constant 0 : index
    %c0_30 = arith.constant 0 : index
    %c64 = arith.constant 64 : index
    %48 = vector.load %arg2[%c0_29, %c0_30, %c64] : memref<1x8x128xf32, #tpu.memory_space<vmem>>, vector<1x8x32xf32>
    %49 = vector.shape_cast %48 : vector<1x8x32xf32> to vector<8x32xf32>
    %c0_31 = arith.constant 0 : index
    %c0_32 = arith.constant 0 : index
    %c64_33 = arith.constant 64 : index
    %50 = vector.load %arg3[%c0_31, %c0_32, %c64_33] : memref<1x8x128xf32, #tpu.memory_space<vmem>>, vector<1x8x32xf32>
    %51 = vector.shape_cast %50 : vector<1x8x32xf32> to vector<8x32xf32>
    %c0_34 = arith.constant 0 : index
    %c0_35 = arith.constant 0 : index
    %c64_36 = arith.constant 64 : index
    %52 = vector.load %arg4[%c0_34, %c0_35, %c64_36] : memref<1x8x128xf32, #tpu.memory_space<vmem>>, vector<1x8x32xf32>
    %53 = vector.shape_cast %52 : vector<1x8x32xf32> to vector<8x32xf32>
    %cst_37 = arith.constant dense<0.000000e+00> : vector<8x8xf32>
    %54 = tpu.matmul %49, %51, %cst_37 {dimension_numbers = #tpu.dot_dimension_numbers<[1], [1], [0], [0], [0, 0, 1, 0], [], []>} : vector<8x32xf32>, vector<8x32xf32>, vector<8x8xf32> -> vector<8x8xf32>
    %cst_38 = arith.constant 0.176776692 : f32
    %55 = vector.broadcast %cst_38 : f32 to vector<8x8xf32>
    %56 = arith.mulf %54, %55 : vector<8x8xf32>
    %cst_39 = arith.constant dense<0xFF800000> : vector<8xf32>
    %57 = vector.multi_reduction <maximumf>, %56, %cst_39 [1] : vector<8x8xf32> to vector<8xf32>
    %58 = vector.shape_cast %57 : vector<8xf32> to vector<8x1xf32>
    %59 = vector.broadcast %58 : vector<8x1xf32> to vector<8x8xf32>
    %60 = arith.subf %56, %59 : vector<8x8xf32>
    %61 = math.exp %60 : vector<8x8xf32>
    %cst_40 = arith.constant dense<0.000000e+00> : vector<8xf32>
    %62 = vector.multi_reduction <add>, %61, %cst_40 [1] : vector<8x8xf32> to vector<8xf32>
    %63 = vector.shape_cast %62 : vector<8xf32> to vector<8x1xf32>
    %64 = tpu.reciprocal %63 : vector<8x1xf32> -> vector<8x1xf32>
    %65 = vector.broadcast %64 : vector<8x1xf32> to vector<8x8xf32>
    %66 = arith.mulf %61, %65 : vector<8x8xf32>
    %67 = arith.addf %66, %0 : vector<8x8xf32>
    %cst_41 = arith.constant dense<0.000000e+00> : vector<8x32xf32>
    %68 = tpu.matmul %67, %53, %cst_41 {dimension_numbers = #tpu.dot_dimension_numbers<[1], [0], [0], [1], [0, 0, 1, 1], [], []>} : vector<8x8xf32>, vector<8x32xf32>, vector<8x32xf32> -> vector<8x32xf32>
    %69 = vector.broadcast %1 : vector<8x1xf32> to vector<8x32xf32>
    %70 = arith.mulf %68, %69 : vector<8x32xf32>
    %c0_42 = arith.constant 0 : index
    %c0_43 = arith.constant 0 : index
    %c96 = arith.constant 96 : index
    %71 = vector.load %arg2[%c0_42, %c0_43, %c96] : memref<1x8x128xf32, #tpu.memory_space<vmem>>, vector<1x8x32xf32>
    %72 = vector.shape_cast %71 : vector<1x8x32xf32> to vector<8x32xf32>
    %c0_44 = arith.constant 0 : index
    %c0_45 = arith.constant 0 : index
    %c96_46 = arith.constant 96 : index
    %73 = vector.load %arg3[%c0_44, %c0_45, %c96_46] : memref<1x8x128xf32, #tpu.memory_space<vmem>>, vector<1x8x32xf32>
    %74 = vector.shape_cast %73 : vector<1x8x32xf32> to vector<8x32xf32>
    %c0_47 = arith.constant 0 : index
    %c0_48 = arith.constant 0 : index
    %c96_49 = arith.constant 96 : index
    %75 = vector.load %arg4[%c0_47, %c0_48, %c96_49] : memref<1x8x128xf32, #tpu.memory_space<vmem>>, vector<1x8x32xf32>
    %76 = vector.shape_cast %75 : vector<1x8x32xf32> to vector<8x32xf32>
    %cst_50 = arith.constant dense<0.000000e+00> : vector<8x8xf32>
    %77 = tpu.matmul %72, %74, %cst_50 {dimension_numbers = #tpu.dot_dimension_numbers<[1], [1], [0], [0], [0, 0, 1, 0], [], []>} : vector<8x32xf32>, vector<8x32xf32>, vector<8x8xf32> -> vector<8x8xf32>
    %cst_51 = arith.constant 0.176776692 : f32
    %78 = vector.broadcast %cst_51 : f32 to vector<8x8xf32>
    %79 = arith.mulf %77, %78 : vector<8x8xf32>
    %cst_52 = arith.constant dense<0xFF800000> : vector<8xf32>
    %80 = vector.multi_reduction <maximumf>, %79, %cst_52 [1] : vector<8x8xf32> to vector<8xf32>
    %81 = vector.shape_cast %80 : vector<8xf32> to vector<8x1xf32>
    %82 = vector.broadcast %81 : vector<8x1xf32> to vector<8x8xf32>
    %83 = arith.subf %79, %82 : vector<8x8xf32>
    %84 = math.exp %83 : vector<8x8xf32>
    %cst_53 = arith.constant dense<0.000000e+00> : vector<8xf32>
    %85 = vector.multi_reduction <add>, %84, %cst_53 [1] : vector<8x8xf32> to vector<8xf32>
    %86 = vector.shape_cast %85 : vector<8xf32> to vector<8x1xf32>
    %87 = tpu.reciprocal %86 : vector<8x1xf32> -> vector<8x1xf32>
    %88 = vector.broadcast %87 : vector<8x1xf32> to vector<8x8xf32>
    %89 = arith.mulf %84, %88 : vector<8x8xf32>
    %90 = arith.addf %89, %0 : vector<8x8xf32>
    %cst_54 = arith.constant dense<0.000000e+00> : vector<8x32xf32>
    %91 = tpu.matmul %90, %76, %cst_54 {dimension_numbers = #tpu.dot_dimension_numbers<[1], [0], [0], [1], [0, 0, 1, 1], [], []>} : vector<8x8xf32>, vector<8x32xf32>, vector<8x32xf32> -> vector<8x32xf32>
    %92 = vector.broadcast %1 : vector<8x1xf32> to vector<8x32xf32>
    %93 = arith.mulf %91, %92 : vector<8x32xf32>
    %94 = tpu.concatenate %24, %47, %70, %93 in 1 : vector<8x32xf32>, vector<8x32xf32>, vector<8x32xf32>, vector<8x32xf32> -> vector<8x128xf32>
    %c0_55 = arith.constant 0 : index
    %c0_56 = arith.constant 0 : index
    %c0_57 = arith.constant 0 : index
    %95 = vector.load %arg7[%c0_55, %c0_56, %c0_57] : memref<1x8x128xf32, #tpu.memory_space<vmem>>, vector<1x8x128xf32>
    %96 = vector.shape_cast %95 : vector<1x8x128xf32> to vector<8x128xf32>
    %97 = vector.shape_cast %94 : vector<8x128xf32> to vector<1x8x128xf32>
    tpu.vector_store %arg7[%c0_55, %c0_56, %c0_57], %97 {strides = array<i32>} : memref<1x8x128xf32, #tpu.memory_space<vmem>>, vector<1x8x128xf32>,
    return
  }
  func.func @transform_0(%arg0: i32, %arg1: i32) -> (i32, i32, i32) {
    %c0_i32 = arith.constant 0 : i32
    %c0_i32_0 = arith.constant 0 : i32
    return %arg0, %arg1, %c0_i32 : i32, i32, i32
  }
  func.func @transform_1(%arg0: i32, %arg1: i32) -> (i32, i32, i32) {
    %c0_i32 = arith.constant 0 : i32
    %c0_i32_0 = arith.constant 0 : i32
    %c0_i32_1 = arith.constant 0 : i32
    return %arg0, %c0_i32, %c0_i32_0 : i32, i32, i32
  }
  func.func @transform_2(%arg0: i32, %arg1: i32) -> (i32, i32, i32) {
    %c0_i32 = arith.constant 0 : i32
    %c0_i32_0 = arith.constant 0 : i32
    %c0_i32_1 = arith.constant 0 : i32
    return %arg0, %c0_i32, %c0_i32_0 : i32, i32, i32
  }
  func.func @transform_3(%arg0: i32, %arg1: i32) -> (i32, i32) {
    %c0_i32 = arith.constant 0 : i32
    %c0_i32_0 = arith.constant 0 : i32
    return %arg1, %c0_i32 : i32, i32
  }
  func.func @transform_4(%arg0: i32, %arg1: i32) -> (i32, i32) {
    %c0_i32 = arith.constant 0 : i32
    %c0_i32_0 = arith.constant 0 : i32
    return %arg1, %c0_i32 : i32, i32
  }
  func.func @transform_5(%arg0: i32, %arg1: i32) -> (i32, i32, i32) {
    %c0_i32 = arith.constant 0 : i32
    %c0_i32_0 = arith.constant 0 : i32
    return %arg0, %arg1, %c0_i32 : i32, i32, i32
  }
}

</mosaic_0001>

<bundles_post_ra>
// kernel: tpu_custom_call.1
= control target key start
LH: loop header
LB: loop body
LE: loop exit
PB: predicated region body
PF: predicated region fallthrough
CT: control target
= control target key end

     0   :  { %s1904_s0 = inlined_call_operand.hbm [shape: f32[2,8,128], index: 0, kind: input, shape index: {}]   ;;  %s1905_s1 = inlined_call_operand.hbm [shape: f32[2,8,128], index: 1, kind: input, shape index: {}]   ;;  %s1906_s2 = inlined_call_operand.hbm [shape: f32[2,8,128], index: 2, kind: input, shape index: {}]   ;;  %s1907_s3 = inlined_call_operand.vmem [shape: f32[8,8], index: 3, kind: input, shape index: {}]   ;;  %s1908_s4 = inlined_call_operand.vmem [shape: f32[8,1], index: 4, kind: input, shape index: {}]   ;;  %s1909_s5 = inlined_call_operand.hbm [shape: f32[2,8,128], index: 5, kind: output, shape index: {}]  }
   0x1   :  { %1915 = sst [smem:[#allocation16_spill]] %s1905_s1 }
   0x2   :  { %10 = vsyncpa [#allocation3], 0 }
   0x3   :  { %12 = vsyncpa [#allocation3 + $0x1], 0 }
   0x4   :  { %13 = vsyncpa [#allocation6], 0 }
   0x5   :  { %15 = vsyncpa [#allocation6 + $0x1], 0 }
   0x6   :  { %16 = vsyncpa [#allocation4], 0 }
   0x7   :  { %18 = vsyncpa [#allocation4 + $0x1], 0  ;;  %s1622_s18 = smov 0   ;;  %s1624_s19 = smov 0  }
   0x8   :  { %s1626_s20 = smov 0   ;;  %s1628_s21 = smov 0  }
   0x9   :  { %s1630_s22 = smov 0   ;;  %s1632_s23 = smov 0  }
   0xa LB: > { %1916 = sst [smem:[#allocation12_spill]] %s1576_s22  ;;  %s1653_s24 = sadd.s32 4294967295, %s1580_s23   ;;  %s1580_s23 = sphi %s1632_s23, %s24_s23   ;;  %s1576_s22 = sphi %s1630_s22, %s1932_s22   ;;  %s1572_s21 = sphi %s1628_s21, %s1931_s21   ;;  %s1568_s20 = sphi %s1626_s20, %s1935_s20   ;;  %s1564_s19 = sphi %s1624_s19, %s1934_s19   ;;  %s1560_s18 = sphi %s1622_s18, %s1933_s18  }
   0xb   : > { %1917 = sst [smem:[#allocation13_spill]] %s1580_s23  ;;  %s1229_s25 = sadd.s32 4294967294, %s1580_s23  }
   0xc   : > { %s36_s26 = sadd.s32 1, %s1576_s22  ;;  %s45_s27 = sadd.s32 1, %s1568_s20 }
   0xd   : > { %p38_p0 = scmp.ge.s32.totalorder %s36_s26, 2  ;;  %p52_p1 = scmp.ne.s32.totalorder %s1568_s20, %s1564_s19 }
   0xe   : > { %p53_p2 = scmp.eq.s32.totalorder %s1580_s23, 0  ;;  %p58_p3 = scmp.ne.s32.totalorder %s1564_s19, %s1560_s18 }
   0xf   : > { %s1937_s26 = smov (%p38_p0, %s36_s26), 0  ;;  %p59_p5 = scmp.eq.s32.totalorder %s1653_s24, 0 }
  0x10   : > { %1918 = sst [smem:[#allocation14_spill]] %s1937_s26  ;;  %p1665_p4 = por %p53_p2, %p52_p1 }
  0x11   : > { %s40_s29 = ssub.s32 %s1576_s22, %s1937_s26  ;;  %p188_p6 = scmp.eq.s32.totalorder %s1653_s24, 1 }
  0x12   : > { %p43_p7 = scmp.eq.s32.totalorder %s40_s29, 0  ;;  %p1673_p8 = por %p59_p5, %p58_p3 }
  0x13   : > { %p1677_p9 = por %p188_p6, %p52_p1  ;;  %p194_p10 = scmp.eq.s32.totalorder %s1229_s25, 1 }
  0x14   : > { %s1682_s7 = scalar_select %p43_p7, %s1568_s20, %s45_s27  }
  0x15   : > { %p1684_p11 = por %p194_p10, %p58_p3  ;;  %p1339_p13 = scmp.lt.s32.totalorder %s1580_s23, 2 }
  0x16   : > { %1922 = sst [smem:[#allocation15_spill]] %s1682_s7  ;;  %s1910_s9 = sand.u32 1, %s1568_s20  }
  0x17   : > { %s1693_s10 = sshll.u32 %s1910_s9, 3  ;;  %s1696_s11 = sshll.u32 %s1576_s22, 7 }
  0x18   : > { %p1700_p0 = pnand %p1339_p13, %p1665_p4  ;;  %s247_s13 = sand.u32 1, %s1580_s23  }
  0x19   : > { %s1925_s1 = sld [smem:[#allocation16_spill]]  ;;  %s251_s17 = scalar_lea.vmem [#allocation5], %s1693_s10 }
  0x1a   : > { %s258_s25 = sshll.u32 %s251_s17, 4  ;;  %p1240_p1 = scmp.ge.s32.totalorder %s1580_s23, 1  ;;  %s259_s25 = int_to_ptr.vmem [resolvable:$true] %s258_s25 }
  0x1b   : > { %p281_p2 = scmp.lt.s32.totalorder %s1580_s23, 3  ;;  %s1712_s27 = scalar_lea.sflag [#allocation6], %s247_s13 }
  0x1c   : > { %p1414_p3 = pneg %p1700_p0  ;;  %s1425_s28 = scalar_lea.vmem %s259_s25, 128 }
  0x1d   : > { %p1426_p4 = scmp.ne.s32.totalorder %s259_s25, %s1425_s28  ;;  %s1582_s29 = smov [#allocation5]  }
  0x1e   : > { %s1430_s9 = sshll.u32 %s1582_s29, 4  ;;  %s1431_s9 = int_to_ptr.vmem [resolvable:$false] %s1430_s9 }
  0x1f   : > { %s256_s16 = scalar_lea.hbm %s1925_s1, %s1696_s11  ;;  %p1428_p5 = pnand %p1426_p4, %p1414_p3 }
  0x20   : > { %s1432_s14 = scalar_lea.vmem %s1431_s9, 256  ;;  %p1433_p7 = scmp.lt.s32.totalorder %s259_s25, %s1431_s9 }
  0x21   : > { %p1429_p6 = pneg %p1428_p5  ;;  %p1434_p10 = scmp.lt.s32.totalorder %s1432_s14, %s1425_s28 }
  0x23   : > { %p1435_p13 = por %p1434_p10, %p1433_p7 }
  0x25   : > { %p1436_p12 = pnand %p1435_p13, %p1429_p6 }
  0x27   : > { %1439 = shalt.err (!%p1436_p12)
}
  0x28   : > { %1331 = dma.hbm_to_vmem [thread:$0]  (!%p1700_p0), %s256_s16, 128, %s259_s25, %s1712_s27  }
  0x29   : > { %p1726_p4 = pnand %p1240_p1, %p281_p2  ;;  %s238_s17 = scalar_lea.hbm %s1904_s0, %s1696_s11 }
  0x2a   : > { %s232_s28 = scalar_lea.vmem [#allocation2], %s1693_s10  ;;  %s274_s26 = scalar_lea.hbm %s1906_s2, %s1696_s11 }
  0x2b   : > { %s240_s29 = sshll.u32 %s232_s28, 4  ;;  %s1927_s22 = sand.u32 1, %s1568_s20   ;;  %s241_s29 = int_to_ptr.vmem [resolvable:$true] %s240_s29 }
  0x2c   : > { %s229_s7 = scalar_lea.sflag [#allocation3], %s1927_s22  ;;  %s1453_s16 = scalar_lea.vmem %s241_s29, 128 }
  0x2d   : > { %p1454_p12 = scmp.ne.s32.totalorder %s241_s29, %s1453_s16  ;;  %s1583_s25 = smov [#allocation2]  }
  0x2e   : > { %s1458_s23 = sshll.u32 %s1583_s25, 4  ;;  %s1459_s23 = int_to_ptr.vmem [resolvable:$false] %s1458_s23 }
  0x2f   : > { %p1456_p1 = pnand %p1454_p12, %p1414_p3  ;;  %s1460_s9 = scalar_lea.vmem %s1459_s23, 256 }
  0x30   : > { %p1461_p5 = scmp.lt.s32.totalorder %s241_s29, %s1459_s23  ;;  %p1462_p6 = scmp.lt.s32.totalorder %s1460_s9, %s1453_s16 }
  0x31   : > { %p1457_p2 = pneg %p1456_p1 }
  0x32   : > { %p1463_p7 = por %p1462_p6, %p1461_p5 }
  0x34   : > { %p1464_p10 = pnand %p1463_p7, %p1457_p2 }
  0x36   : > { %1467 = shalt.err (!%p1464_p10)
}
  0x37   : > { %1328 = dma.hbm_to_vmem [thread:$0]  (!%p1700_p0), %s238_s17, 128, %s241_s29, %s229_s7  }
  0x38   : > { %s269_s1 = scalar_lea.vmem [#allocation7], %s1693_s10  ;;  %s1584_s28 = smov [#allocation7]  }
  0x39   : > { %s276_s22 = sshll.u32 %s269_s1, 4  ;;  %s1486_s23 = sshll.u32 %s1584_s28, 4  ;;  %s277_s22 = int_to_ptr.vmem [resolvable:$true] %s276_s22  ;;  %s1487_s23 = int_to_ptr.vmem [resolvable:$false] %s1486_s23 }
  0x3a   : > { %s1481_s15 = scalar_lea.vmem %s277_s22, 128  ;;  %s1488_s14 = scalar_lea.vmem %s1487_s23, 256 }
  0x3b   : > { %p1482_p13 = scmp.ne.s32.totalorder %s277_s22, %s1481_s15  ;;  %p1489_p2 = scmp.lt.s32.totalorder %s277_s22, %s1487_s23 }
  0x3c   : > { %p1490_p5 = scmp.lt.s32.totalorder %s1488_s14, %s1481_s15 }
  0x3d   : > { %p1484_p12 = pnand %p1482_p13, %p1414_p3 }
  0x3e   : > { %p1491_p6 = por %p1490_p5, %p1489_p2 }
  0x3f   : > { %p1485_p1 = pneg %p1484_p12 }
  0x41   : > { %p1492_p7 = pnand %p1491_p6, %p1485_p1 }
  0x43   : > { %1495 = shalt.err (!%p1492_p7)
}
  0x44   : > { %1334 = dma.hbm_to_vmem [thread:$0]  (!%p1700_p0), %s274_s26, 128, %s277_s22, %s1712_s27  }
  0x45   : > { %285 = sbr.rel (%p1726_p4) target bundleno = 1483 (0x5cb), region = 40  ;;  %s1761_s17 = sand.u32 (!%p1726_p4), 1, %s1564_s19  }
  0x46   : > { %s1764_s29 = sshll.u32 (!%p1726_p4), %s1761_s17, 3  ;;  %s288_s12 = scalar_lea.sflag (!%p1726_p4), [#allocation3], %s1761_s17 }
  0x47   : > { %s291_s16 = scalar_lea.vmem (!%p1726_p4), [#allocation2], %s1764_s29 }
  0x4a   : > { %1547 = dma.done.wait (%p1673_p8), %s288_s12, 128  }
  0x4b   : > { %1549 = vsyncadd (%p1673_p8), %s288_s12, 4294967168  ;;  %s296_s26 = sand.u32 1, %s1653_s24   ;;  %s300_s27 = scalar_lea.vmem [#allocation5], %s1764_s29 }
  0x4c   : > { %s297_s11 = scalar_lea.sflag [#allocation6], %s296_s26 }
  0x4d   : > { %1551 = dma.done.wait (%p1673_p8), %s297_s11, 256  }
  0x4e   : > { %1553 = vsyncadd (%p1673_p8), %s297_s11, 4294967040  ;;  %v1585_v0 = vmov 0.0   ;;  %vm1586_vm0 = vmmov 0   ;;  %vm367_vm1 = vcmask 261120   ;;  %v365_v1 = vld [vmem:[%s300_s27] sm:$0xff]  ;;  %v364_v2 = vld [vmem:[%s291_s16] sm:$0xff] }
  0x4f   : > { %1277 = vmatprep.subr.mxu0 %v1585_v0  ;;  %1279 = vmatprep.mubr.msk.f32.mxu0 %vm1586_vm0, %v1585_v0  ;;  %vm445_vm2 = vcmask 64512   ;;  %s1587_s24 = smov 96   ;;  %s1588_s30 = smov 64   ;;  %v1805_v17 = vld [vmem:[%s1907_s3] sm:$0xff]  ;;  %v1590_v38 = vmov 0   ;;  %vm1055_vm3 = vcmask 523264  }
  0x50   : > { %1282 = vmatprep.subr.mxu1 %v1585_v0  ;;  %1284 = vmatprep.mubr.msk.f32.mxu1 %vm1586_vm0, %v1585_v0  ;;  %s1589_s13 = smov 32   ;;  %s309_s25 = scalar_lea.vmem [#allocation7], %s1764_s29  ;;  %v363_v50 = vld [vmem:[%s1908_s4] sm:$0xff]  ;;  %vm1057_vm4 = vcmask 785408  }
  0x51   : > { %1278 = vmatpush3.xpose.msk.msra.mxu0 %vm367_vm1, %v365_v1  ;;  %539 = vrot.lane.b32.xlu1 %v365_v1, %s1587_s24  ;;  %v1797_v12 = vld [vmem:[%s309_s25] sm:$0xff]  ;;  %s1258_s28 = sshll.u32 %s1572_s21, 7  ;;  %s353_s23 = scalar_lea.vmem [#allocation8], %s1764_s29 }
  0x52   : > { %1292 = vmatprep.subr.mxu0 %v1585_v0  ;;  %1283 = vmatpush3.msra.mxu1 %v1797_v12  ;;  %s1075_s14 = sshll.u32 %s353_s23, 4  ;;  %s1862_s12 = scalar_lea.hbm %s1909_s5, %s1258_s28  ;;  %s1076_s14 = int_to_ptr.vmem [resolvable:$true] %s1075_s14 }
  0x53   : > { %1287 = vmatprep.subr.mxu1 %v1585_v0  ;;  %1395 = vset.pattern.permute.xlu0 %v1590_v38  ;;  %s1061_s16 = scalar_lea.sflag [#allocation4], %s1761_s17  ;;  %s1496_s26 = scalar_lea.vmem %s1076_s14, 128 }
  0x54   : > { %1280 = vmatmul.mubr.msk.f32.vlgmr.msra.gmra.mxu0 %vm367_vm1, %v364_v2  ;;  %p1497_p8 = scmp.ne.s32.totalorder %s1076_s14, %s1496_s26  ;;  %s1591_s21 = smov [#allocation8]  }
  0x55   : > { %1294 = vmatprep.mubr.msk.f32.mxu0 %vm1586_vm0, %v1585_v0  ;;  %537 = vrot.lane.b32.xlu1 %v364_v2, %s1587_s24  ;;  %s1500_s29 = sshll.u32 %s1591_s21, 4  ;;  %s1501_s29 = int_to_ptr.vmem [resolvable:$false] %s1500_s29 }
  0x56   : > { %p1498_p0 = pnand %p1497_p8, %p1677_p9  ;;  %s1502_s11 = scalar_lea.vmem %s1501_s29, 256 }
  0x57   : > { %p1503_p4 = scmp.lt.s32.totalorder %s1076_s14, %s1501_s29  ;;  %p1504_p10 = scmp.lt.s32.totalorder %s1502_s11, %s1496_s26 }
  0x58   : > { %p1499_p3 = pneg %p1498_p0 }
  0x59   : > { %706 = vrot.lane.b32.xlu1 %v364_v2, %s1588_s30  ;;  %p1505_p13 = por %p1504_p10, %p1503_p4 }
  0x5b   : > { %p1506_p12 = pnand %p1505_p13, %p1499_p3 }
  0x5d   : > { %876 = vrot.lane.b32.xlu1 %v365_v1, %s1589_s13 }
  0x61   : > { %874 = vrot.lane.b32.xlu1 %v364_v2, %s1589_s13 }
  0xc3   : > { %v540_v14 = vpop.permute.xlu1 %539 }
  0xc7   : > { %v538_v15 = vpop.permute.xlu1 %537 }
  0xcb   : > { %v707_v19 = vpop.permute.xlu1 %706 }
  0xcf   : > { %v877_v22 = vpop.permute.xlu1 %876 }
  0xd3   : > { %v875_v23 = vpop.permute.xlu1 %874 }
 0x114   : > { %v440_v3 = vpop.f32.mrf.mxu0 }
 0x115   : > { %v444_v4 = vmul.f32 0.17677669, %v440_v3 }
 0x116   : > { %v1281_v5 = vpop.f32.mrf.mxu0 }
 0x117   : > { %v446_v6 = vsel %vm445_vm2, %v444_v4, -inf }
 0x118   : > { %447 = vmax.xlane.f32.xlu0 %v446_v6 }
 0x1a1   : > { %v448_v7 = vpop.xlane.xlu0 %447 }
 0x1a2   : > { %v449_v8 = vsub.f32 %v444_v4, %v448_v7 }
 0x1a4   : > { %v450_v9 = vmul.f32 1.442695, %v449_v8 }
 0x1a6   : > { %1396 = vpow2.f32 %v450_v9 }
 0x1b3   : > { %v1397_v10 = vpop.eup %1396 }
 0x1b4   : > { %v452_v11 = vsel %vm445_vm2, %v1397_v10, 0.0 }
 0x1b5   : > { %453 = vadd.xlane.f32.xlu0 %v452_v11 }
 0x1cb   : > { %708 = vrot.lane.b32.xlu0 %v365_v1, %s1588_s30 }
 0x23e   : > { %v454_v13 = vpop.xlane.xlu0 %453 }
 0x23f   : > { %1398 = vrcp.f32 %v454_v13 }
 0x242   : > { %v709_v21 = vpop.permute.xlu0 %708 }
 0x24c   : > { %v1399_v16 = vpop.eup %1398 }
 0x24d   : > { %v456_v18 = vmul.f32 %v1399_v16, %v1397_v10 }
 0x24f   : > { %v457_v20 = vadd.f32 %v456_v18, %v1805_v17 }
 0x251   : > { %1285 = vmatmul.mubr.msk.f32.vlgmr.msra.gmra.mxu1 %vm445_vm2, %v457_v20 }
 0x252   : > { %1288 = vmatpush3.xpose.msk.msra.mxu1 %vm367_vm1, %v540_v14  ;;  %1289 = vmatprep.mubr.msk.f32.mxu1 %vm1586_vm0, %v1585_v0 }
 0x253   : > { %1297 = vmatprep.subr.mxu1 %v1585_v0 }
 0x255   : > { %1290 = vmatmul.mubr.msk.f32.vlgmr.msra.gmra.mxu1 %vm367_vm1, %v538_v15 }
 0x256   : > { %1298 = vmatpush3.xpose.msk.msra.mxu1 %vm367_vm1, %v709_v21  ;;  %1299 = vmatprep.mubr.msk.f32.mxu1 %vm1586_vm0, %v1585_v0 }
 0x257   : > { %1307 = vmatprep.subr.mxu1 %v1585_v0 }
 0x259   : > { %1300 = vmatmul.mubr.msk.f32.vlgmr.msra.gmra.mxu1 %vm367_vm1, %v707_v19 }
 0x25a   : > { %1308 = vmatpush3.xpose.msk.msra.mxu1 %vm367_vm1, %v877_v22  ;;  %1309 = vmatprep.mubr.msk.f32.mxu1 %vm1586_vm0, %v1585_v0 }
 0x25d   : > { %1310 = vmatmul.mubr.msk.f32.vlgmr.msra.gmra.mxu1 %vm367_vm1, %v875_v23 }
 0x311   : > { %v1823_v24 = vpop.f32.mrf.mxu1 }
 0x313   : > { %v1286_v25 = vpop.f32.mrf.mxu1 }
 0x315   : > { %v611_v26 = vpop.f32.mrf.mxu1 }
 0x316   : > { %v615_v27 = vmul.f32 0.17677669, %v611_v26 }
 0x317   : > { %v1291_v28 = vpop.f32.mrf.mxu1 }
 0x318   : > { %v616_v29 = vsel %vm445_vm2, %v615_v27, -inf }
 0x319   : > { %617 = vmax.xlane.f32.xlu1 %v616_v29  ;;  %v780_v30 = vpop.f32.mrf.mxu1 }
 0x31a   : > { %v784_v31 = vmul.f32 0.17677669, %v780_v30 }
 0x31b   : > { %v1301_v32 = vpop.f32.mrf.mxu1 }
 0x31c   : > { %v785_v33 = vsel %vm445_vm2, %v784_v31, -inf }
 0x31d   : > { %786 = vmax.xlane.f32.xlu0 %v785_v33  ;;  %v948_v34 = vpop.f32.mrf.mxu1 }
 0x31e   : > { %v952_v35 = vmul.f32 0.17677669, %v948_v34 }
 0x31f   : > { %v1311_v36 = vpop.f32.mrf.mxu1 }
 0x320   : > { %v953_v37 = vsel %vm445_vm2, %v952_v35, -inf }
 0x321   : > { %954 = vmax.xlane.f32.xlu1 %v953_v37 }
 0x3a2   : > { %v618_v39 = vpop.xlane.xlu1 %617 }
 0x3a3   : > { %v619_v40 = vsub.f32 %v615_v27, %v618_v39 }
 0x3a5   : > { %v620_v41 = vmul.f32 1.442695, %v619_v40 }
 0x3a6   : > { %v787_v42 = vpop.xlane.xlu0 %786 }
 0x3a7   : > { %1400 = vpow2.f32 %v620_v41  ;;  %v788_v43 = vsub.f32 %v784_v31, %v787_v42 }
 0x3a9   : > { %v789_v44 = vmul.f32 1.442695, %v788_v43 }
 0x3aa   : > { %v955_v49 = vpop.xlane.xlu1 %954 }
 0x3ab   : > { %1402 = vpow2.f32 %v789_v44  ;;  %v956_v51 = vsub.f32 %v952_v35, %v955_v49 }
 0x3ad   : > { %v957_v52 = vmul.f32 1.442695, %v956_v51 }
 0x3af   : > { %1404 = vpow2.f32 %v957_v52 }
 0x3b4   : > { %v1401_v45 = vpop.eup %1400 }
 0x3b5   : > { %v622_v46 = vsel %vm445_vm2, %v1401_v45, 0.0 }
 0x3b6   : > { %623 = vadd.xlane.f32.xlu1 %v622_v46 }
 0x3b8   : > { %v1403_v47 = vpop.eup %1402 }
 0x3b9   : > { %v791_v48 = vsel %vm445_vm2, %v1403_v47, 0.0 }
 0x3ba   : > { %792 = vadd.xlane.f32.xlu0 %v791_v48 }
 0x3bc   : > { %v1405_v53 = vpop.eup %1404 }
 0x3bd   : > { %v959_v54 = vsel %vm445_vm2, %v1405_v53, 0.0 }
 0x3c7   : > { %797 = vrot.lane.b32.xlu1 %v1797_v12, %s1588_s30 }
 0x3d0   : > { %629 = vrot.lane.b32.xlu0 %v1797_v12, %s1587_s24 }
 0x3d4   : > { %533 = vperm.xlu0 %1395, %v363_v50  }
 0x3eb   : > { %960 = vadd.xlane.f32.xlu1 %v959_v54 }
 0x3fc   : > { %965 = vrot.lane.b32.xlu1 %v1797_v12, %s1589_s13 }
 0x43f   : > { %v624_v55 = vpop.xlane.xlu1 %623 }
 0x440   : > { %1406 = vrcp.f32 %v624_v55 }
 0x443   : > { %v793_v56 = vpop.xlane.xlu0 %792  ;;  %v798_v62 = vpop.permute.xlu1 %797 }
 0x444   : > { %1408 = vrcp.f32 %v793_v56 }
 0x447   : > { %v630_v57 = vpop.permute.xlu0 %629 }
 0x448   : > { %1293 = vmatpush3.msra.mxu0 %v630_v57 }
 0x449   : > { %1302 = vmatprep.subr.mxu0 %v1585_v0 }
 0x44d   : > { %v1407_v58 = vpop.eup %1406 }
 0x44e   : > { %v626_v59 = vmul.f32 %v1407_v58, %v1401_v45 }
 0x44f   : > { %v534_v7 = vpop.permute.xlu0 %533 }
 0x450   : > { %v627_v60 = vadd.f32 %v626_v59, %v1805_v17 }
 0x451   : > { %v1409_v61 = vpop.eup %1408 }
 0x452   : > { %1295 = vmatmul.mubr.msk.f32.vlgmr.msra.gmra.mxu0 %vm445_vm2, %v627_v60  ;;  %v795_v63 = vmul.f32 %v1409_v61, %v1403_v47 }
 0x453   : > { %1303 = vmatpush3.msra.mxu0 %v798_v62  ;;  %1304 = vmatprep.mubr.msk.f32.mxu0 %vm1586_vm0, %v1585_v0 }
 0x454   : > { %v796_v1 = vadd.f32 %v795_v63, %v1805_v17  ;;  %1312 = vmatprep.subr.mxu0 %v1585_v0 }
 0x456   : > { %1305 = vmatmul.mubr.msk.f32.vlgmr.msra.gmra.mxu0 %vm445_vm2, %v796_v1 }
 0x457   : > { %1314 = vmatprep.mubr.msk.f32.mxu0 %vm1586_vm0, %v1585_v0 }
 0x474   : > { %v961_v2 = vpop.xlane.xlu1 %960 }
 0x475   : > { %1410 = vrcp.f32 %v961_v2 }
 0x478   : > { %v966_v3 = vpop.permute.xlu1 %965 }
 0x479   : > { %1313 = vmatpush3.msra.mxu0 %v966_v3 }
 0x482   : > { %v1411_v4 = vpop.eup %1410 }
 0x483   : > { %v963_v5 = vmul.f32 %v1411_v4, %v1405_v53 }
 0x485   : > { %v964_v6 = vadd.f32 %v963_v5, %v1805_v17  ;;  %v536_v17 = vmul.f32 %v534_v7, %v1823_v24 }
 0x487   : > { %1315 = vmatmul.mubr.msk.f32.vlgmr.msra.gmra.mxu0 %vm445_vm2, %v964_v6 }
 0x512   : > { %v701_v8 = vpop.f32.mrf.mxu0 }
 0x513   : > { %v705_v9 = vmul.f32 %v701_v8, %v534_v7 }
 0x514   : > { %v1296_v10 = vpop.f32.mrf.mxu0 }
 0x515   : > { %1043 = vrot.lane.b32.xlu1 %v705_v9, %s1589_s13 }
 0x516   : > { %v869_v11 = vpop.f32.mrf.mxu0 }
 0x517   : > { %v873_v0 = vmul.f32 %v869_v11, %v534_v7 }
 0x518   : > { %v1306_v12 = vpop.f32.mrf.mxu0 }
 0x519   : > { %1047 = vrot.lane.b32.xlu1 %v873_v0, %s1588_s30 }
 0x547   : > { %v1037_v13 = vpop.f32.mrf.mxu0 }
 0x548   : > { %v1041_v14 = vmul.f32 %v1037_v13, %v534_v7 }
 0x549   : > { %v1316_v15 = vpop.f32.mrf.mxu0 }
 0x54a   : > { %1051 = vrot.lane.b32.xlu0 %v1041_v14, %s1587_s24 }
 0x587   : > { %v1044_v16 = vpop.permute.xlu1 %1043 }
 0x588   : > { %v1054_v19 = vsel %vm367_vm1, %v536_v17, %v1044_v16 }
 0x58b   : > { %v1048_v18 = vpop.permute.xlu1 %1047 }
 0x58c   : > { %v1056_v20 = vsel %vm1055_vm3, %v1054_v19, %v1048_v18 }
 0x5bc   : > { %v1052_v21 = vpop.permute.xlu0 %1051 }
 0x5bd   : > { %v1058_v22 = vsel %vm1057_vm4, %v1056_v20, %v1052_v21 }
 0x5be   : > { %1059 = vst [vmem:[%s353_s23] sm:$0xff] %v1058_v22 }
 0x5bf   : > { %1509 = shalt.err (!%p1506_p12)
}
 0x5c0   : > { %s1510_s27 = scalar_lea.hbm %s1862_s12, 128  ;;  %s1514_s30 = scalar_lea.hbm %s1909_s5, 256 }
 0x5c1   : > { %p1511_p1 = scmp.ne.s32.totalorder %s1862_s12, %s1510_s27  ;;  %p1515_p6 = scmp.lt.s32.totalorder %s1862_s12, %s1909_s5 }
 0x5c2   : > { %p1516_p7 = scmp.lt.s32.totalorder %s1514_s30, %s1510_s27 }
 0x5c3   : > { %p1512_p2 = pnand %p1511_p1, %p1677_p9 }
 0x5c4   : > { %p1517_p8 = por %p1516_p7, %p1515_p6 }
 0x5c5   : > { %p1513_p5 = pneg %p1512_p2 }
 0x5c7   : > { %p1518_p0 = pnand %p1517_p8, %p1513_p5 }
 0x5c9   : > { %1521 = shalt.err (!%p1518_p0)
}
 0x5ca   : > { %1323 = dma.vmem_to_hbm [thread:$0]  (%p1677_p9), %s1076_s14, 128, %s1862_s12, %s1061_s16  }
 0x5cb PF: > { %s1928_s9 = sld [smem:[#allocation13_spill]]  ;;  %s1087_s1 = sand.u32 1, %s1560_s18  }
 0x5cc   : > { %s1088_s22 = scalar_lea.sflag [#allocation4], %s1087_s1 }
 0x5d1   : > { %p1929_p3 = scmp.ge.s32.totalorder %s1928_s9, 2 }
 0x5d3   : > { %p1336_p4 = pnand %p1929_p3, %p1684_p11 }
 0x5d5   : > { %p1337_p10 = pneg %p1336_p4 }
 0x5d7   : > { %1555 = dma.done.wait (%p1337_p10), %s1088_s22, 128  }
 0x5d8   : > { %1557 = vsyncadd (%p1337_p10), %s1088_s22, 4294967168  ;;  %s24_s23 = sadd.s32 1, %s1928_s9   ;;  %s1930_s6 = sld [smem:[#allocation15_spill]] }
 0x5d9   : > { %p21_p13 = scmp.ge.s32.totalorder %s24_s23, 4   ;;  %s1931_s21 = sld [smem:[#allocation12_spill]] }
 0x5da   : > { %s1932_s22 = sld [smem:[#allocation14_spill]]  ;;  %s1933_s18 = smov %s1564_s19 }
 0x5db   : > { %s1934_s19 = smov %s1568_s20  ;;  %23 = sbr.rel (!%p21_p13) target bundleno = 10 (0xa), region = 115 }
 0x5de   : > { %s1935_s20 = smov %s1930_s6 }
 0x5e0   :  { %1093 = vsyncpa [#allocation3], 1 }
 0x5e1   :  { %1095 = vsyncpa [#allocation3 + $0x1], 1 }
 0x5e2   :  { %1096 = vsyncpa [#allocation6], 1 }
 0x5e3   :  { %1098 = vsyncpa [#allocation6 + $0x1], 1 }
 0x5e4   :  { %1099 = vsyncpa [#allocation4], 1 }
 0x5e5   :  { %1101 = vsyncpa [#allocation4 + $0x1], 1 }

</bundles_post_ra>
